<compile_context>
chip_gen: v7x
topology: tpu7x:2x2x1
jax: 0.10.0
libtpu: 0.0.40
codegen_flags: <defaults>
</compile_context>

<pallas_src>
import jax
import jax.numpy as jnp
from jax.experimental import pallas as pl
from jax.experimental.pallas import tpu as pltpu


LANES = 128
SUB_ROWS = 1024                       # compute-chunk rows (512 KiB f32 temporaries, proven safe)
TARGET_BLOCK_BYTES = 4 * 1024 * 1024  # ~4 MiB per input block -> DMA time >> per-step overhead


def _make_fused_kernel(num_tiles, tile_rows, sub_rows, num_chunks, valid_rows,
                       inv_count, num_params, needs_mask):
    """Streaming sum-of-squared-differences + fused ADMM-regularizer epilogue."""

    def kernel(lam_ref, pen_ref, yp_ref, yg_ref, th_ref, psi_ref, out_ref, part_ref):
        i = pl.program_id(0)

        @pl.when(i == 0)
        def _():
            part_ref[...] = jnp.zeros_like(part_ref)

        # Hoisted once per grid step (constant across the chunk loop).
        if needs_mask:
            base_iota = jax.lax.broadcasted_iota(jnp.int32, (sub_rows, LANES), 0)

        def chunk_body(j, acc):
            start = pl.multiple_of(j * sub_rows, sub_rows)
            # cast on load -> f32 accumulation regardless of HBM dtype (bf16 stays bf16 in HBM)
            d = (yp_ref[pl.ds(start, sub_rows), :].astype(jnp.float32)
                 - yg_ref[pl.ds(start, sub_rows), :].astype(jnp.float32))
            if needs_mask:
                # zero rows past the end of the logical array BEFORE squaring/accumulating
                # (the overhanging part of the last tile's VMEM buffer is unspecified).
                row = i * tile_rows + start + base_iota
                d = jnp.where(row < valid_rows, d, 0.0)
            sq = d * d
            # tile-aligned fold onto one vreg-shaped (8,128) accumulator: pure VPU adds,
            # the single cross-lane/sublane reduce is deferred to the epilogue.
            return acc + jnp.sum(sq.reshape(sub_rows // 8, 8, LANES), axis=0)

        acc = jax.lax.fori_loop(0, num_chunks, chunk_body,
                                jnp.zeros((8, LANES), jnp.float32))
        part_ref[...] += acc

        @pl.when(i == num_tiles - 1)
        def _():
            # data fidelity: MSE with the *global* element count (baked static constant)
            mse = jnp.sum(part_ref[...]) * inv_count
            # ADMM regularizer: penalty/2 * sum_k (theta_k - psi_k + lambda_k)^2  (elementwise,
            # matching the PyTorch module which broadcasts the scalar objective onto it).
            reg = jnp.zeros(out_ref.shape, jnp.float32)
            for k in range(num_params):          # K is small & static -> unrolled
                r = (th_ref[k].astype(jnp.float32)
                     - psi_ref[k].astype(jnp.float32) + lam_ref[k])
                reg = reg + r * r
            out_ref[...] = (mse + 0.5 * pen_ref[0] * reg).astype(out_ref.dtype)

    return kernel


def stochastic_admm_loss(y_pred, y_gt, theta_stack, psi_stack, lam, penalty,
                         *, target_block_bytes=TARGET_BLOCK_BYTES):
    """y_pred/y_gt: any-shape float tensors (same shape); theta/psi: (K,PH,PW); lam: (K,)."""
    assert y_pred.shape == y_gt.shape
    n = int(y_pred.size)
    K, PH, PW = theta_stack.shape
    # The (PH, PW) output / theta blocks use block_shape == full array dims, so general
    # parameter shapes are allowed (non-multiple-of-128 PW just falls back to masked stores).

    # ---- flat, lane-dense view of predictions (free reshape in the common case) ----
    flat_p = y_pred.reshape(-1)
    flat_g = y_gt.reshape(-1)
    rows = max(-(-n // LANES), 8)          # at least one (8,128) tile of rows
    padded_n = rows * LANES
    if padded_n != n:
        # TODO(synk): tail-only zero pad (an XLA copy) — only hit when n is not a multiple of
        # 128 or the input is smaller than 1024 elements; identical zero padding of pred and gt
        # makes the padded elements contribute 0.
        flat_p = jnp.pad(flat_p, (0, padded_n - n))
        flat_g = jnp.pad(flat_g, (0, padded_n - n))
    yp2 = flat_p.reshape(rows, LANES)
    yg2 = flat_g.reshape(rows, LANES)

    # ---- tile sizing: ~4 MiB per input block regardless of dtype; chunked compute ----
    itemsize = jnp.dtype(y_pred.dtype).itemsize
    tr = max(8, target_block_bytes // (LANES * itemsize))   # 8192 f32 / 16384 bf16
    tr = min(tr, (rows // 8) * 8)                           # never exceed the array extent
    sub = min(SUB_ROWS, tr)                                 # compute-chunk rows (multiple of 8)
    tr = (tr // sub) * sub                                  # DMA block = whole number of chunks
    num_chunks = tr // sub
    num_tiles = -(-rows // tr)
    needs_mask = (rows % tr) != 0                           # ragged last tile -> in-kernel mask

    kernel = _make_fused_kernel(num_tiles, tr, sub, num_chunks, rows,
                                1.0 / float(n), K, needs_mask)

    pen = jnp.asarray([penalty], jnp.float32)
    lam32 = lam.astype(jnp.float32)       # K scalars -> negligible; keeps SMEM reads in f32

    out = pl.pallas_call(
        kernel,
        out_shape=jax.ShapeDtypeStruct((PH, PW), jnp.float32),
        grid=(num_tiles,),
        in_specs=[
            pl.BlockSpec(memory_space=pltpu.MemorySpace.SMEM),     # lambda (K,) scalars
            pl.BlockSpec(memory_space=pltpu.MemorySpace.SMEM),     # penalty (1,)
            pl.BlockSpec((tr, LANES), lambda i: (i, 0)),           # y_pred slab (native dtype)
            pl.BlockSpec((tr, LANES), lambda i: (i, 0)),           # y_gt slab   (native dtype)
            pl.BlockSpec((K, PH, PW), lambda i: (0, 0, 0)),        # theta: DMA'd once, resident
            pl.BlockSpec((K, PH, PW), lambda i: (0, 0, 0)),        # psi:   DMA'd once, resident
        ],
        out_specs=pl.BlockSpec((PH, PW), lambda i: (0, 0)),        # written in the last step
        scratch_shapes=[pltpu.VMEM((8, LANES), jnp.float32)],      # resident partial-sum vreg
        compiler_params=pltpu.CompilerParams(
            dimension_semantics=("arbitrary",),
            vmem_limit_bytes=32 * 1024 * 1024,
        ),
    )(lam32, pen, yp2, yg2, theta_stack, psi_stack)
    return out


if __name__ == "__main__":
    key = jax.random.PRNGKey(0)
    k1, k2, k3, k4 = jax.random.split(key, 4)

    # small, module-consistent shapes
    N, C, H, W = 2, 4, 16, 16          # y_pred / y_gt
    K, PH, PW = 3, 8, 128              # 3 theta parameters, each (8,128)

    y_pred = jax.random.normal(k1, (N, C, H, W), jnp.float32)
    y_gt   = jax.random.normal(k2, (N, C, H, W), jnp.float32)
    theta  = jax.random.normal(k3, (K, PH, PW), jnp.float32)
    psi    = jax.random.normal(k4, (K, PH, PW), jnp.float32)
    lam    = jnp.array([0.1, -0.2, 0.05], jnp.float32)   # scalar Lagrange multipliers
    penalty = 1.0                                        # init_penalty default

    def ref_loss(yp, yg, th, ps, lm, pen):
        mse = jnp.mean((yp.astype(jnp.float32) - yg.astype(jnp.float32)) ** 2)
        reg = 0.5 * pen * jnp.sum(
            (th.astype(jnp.float32) - ps.astype(jnp.float32) + lm[:, None, None]) ** 2, axis=0)
        return mse + reg

    # f32 path (single tile, no mask)
    out = jax.block_until_ready(stochastic_admm_loss(y_pred, y_gt, theta, psi, lam, penalty))
    assert out.shape == (PH, PW)
    assert jnp.allclose(out, ref_loss(y_pred, y_gt, theta, psi, lam, penalty),
                        atol=1e-5, rtol=1e-5)

    # bf16 predictions stay bf16 in HBM (half the DMA bytes); accumulation is still f32
    yp_bf = y_pred.astype(jnp.bfloat16)
    yg_bf = y_gt.astype(jnp.bfloat16)
    out_bf = jax.block_until_ready(stochastic_admm_loss(yp_bf, yg_bf, theta, psi, lam, penalty))
    assert jnp.allclose(out_bf, ref_loss(yp_bf, yg_bf, theta, psi, lam, penalty),
                        atol=1e-3, rtol=1e-3)

    # ragged element count (n = 1155): exercises tail-pad fallback + multi-tile + row mask
    yp_odd = jax.random.normal(k1, (3, 5, 7, 11), jnp.float32)
    yg_odd = jax.random.normal(k2, (3, 5, 7, 11), jnp.float32)
    out_odd = jax.block_until_ready(stochastic_admm_loss(yp_odd, yg_odd, theta, psi, lam, penalty))
    assert jnp.allclose(out_odd, ref_loss(yp_odd, yg_odd, theta, psi, lam, penalty),
                        atol=1e-5, rtol=1e-5)

    # forced-tiny blocks: exercises multi-tile streaming accumulation with the fused epilogue
    out_mt = jax.block_until_ready(stochastic_admm_loss(
        y_pred, y_gt, theta, psi, lam, penalty, target_block_bytes=8 * LANES * 4))
    assert jnp.allclose(out_mt, ref_loss(y_pred, y_gt, theta, psi, lam, penalty),
                        atol=1e-5, rtol=1e-5)

    print("KERNEL_OK")
</pallas_src>

<mosaic_0001>
module attributes {stable_mosaic.version = 11 : i64} {
  func.func @kernel(%arg0: i32, %arg1: memref<3xf32, #tpu.memory_space<smem>>, %arg2: memref<1xf32, #tpu.memory_space<smem>>, %arg3: memref<16x128xf32, #tpu.memory_space<vmem>>, %arg4: memref<16x128xf32, #tpu.memory_space<vmem>>, %arg5: memref<3x8x128xf32, #tpu.memory_space<vmem>>, %arg6: memref<3x8x128xf32, #tpu.memory_space<vmem>>, %arg7: memref<8x128xf32, #tpu.memory_space<vmem>>, %arg8: memref<8x128xf32, #tpu.memory_space<vmem>>) attributes {dimension_semantics = [#tpu.dimension_semantics<arbitrary>], iteration_bounds = array<i64: 1>, scalar_prefetch = 0 : i64, scratch_operands = 1 : i64, tpu.core_type = #tpu.core_type<tc>, window_params = [{transform_indices = @transform_0, window_bounds = array<i64: 3>}, {transform_indices = @transform_1, window_bounds = array<i64: 1>}, {transform_indices = @transform_2, window_bounds = array<i64: 16, 128>}, {transform_indices = @transform_3, window_bounds = array<i64: 16, 128>}, {pipeline_mode = #tpu.pipeline_mode<synchronous>, transform_indices = @transform_4, window_bounds = array<i64: 3, 8, 128>}, {pipeline_mode = #tpu.pipeline_mode<synchronous>, transform_indices = @transform_5, window_bounds = array<i64: 3, 8, 128>}, {pipeline_mode = #tpu.pipeline_mode<synchronous>, transform_indices = @transform_6, window_bounds = array<i64: 8, 128>}]} {
    %c0_i32 = arith.constant 0 : i32
    %0 = arith.cmpi eq, %arg0, %c0_i32 : i32
    %1 = arith.extui %0 : i1 to i32
    %c0_i32_0 = arith.constant 0 : i32
    %2 = arith.cmpi ne, %1, %c0_i32_0 : i32
    scf.if %2 {
      %cst_10 = arith.constant 0.000000e+00 : f32
      %21 = vector.broadcast %cst_10 : f32 to vector<8x128xf32>
      %c0_11 = arith.constant 0 : index
      %c0_12 = arith.constant 0 : index
      %22 = vector.load %arg8[%c0_11, %c0_12] : memref<8x128xf32, #tpu.memory_space<vmem>>, vector<8x128xf32>
      tpu.vector_store %arg8[%c0_11, %c0_12], %21 {strides = array<i32>} : memref<8x128xf32, #tpu.memory_space<vmem>>, vector<8x128xf32>,
    } else {
    }
    %cst = arith.constant 0.000000e+00 : f32
    %3 = vector.broadcast %cst : f32 to vector<8x128xf32>
    %c0_i32_1 = arith.constant 0 : i32
    %c16_i32 = arith.constant 16 : i32
    %4 = arith.muli %c0_i32_1, %c16_i32 : i32
    %5 = tpu.assume_multiple %4, 16 : i32
    %6 = arith.index_cast %5 : i32 to index
    %c0 = arith.constant 0 : index
    %7 = vector.load %arg3[%6, %c0] : memref<16x128xf32, #tpu.memory_space<vmem>>, vector<16x128xf32>
    %8 = arith.index_cast %5 : i32 to index
    %c0_2 = arith.constant 0 : index
    %9 = vector.load %arg4[%8, %c0_2] : memref<16x128xf32, #tpu.memory_space<vmem>>, vector<16x128xf32>
    %10 = arith.subf %7, %9 : vector<16x128xf32>
    %11 = arith.mulf %10, %10 : vector<16x128xf32>
    %12 = vector.shape_cast %11 : vector<16x128xf32> to vector<2x8x128xf32>
    %cst_3 = arith.constant dense<0.000000e+00> : vector<8x128xf32>
    %13 = vector.multi_reduction <add>, %12, %cst_3 [0] : vector<2x8x128xf32> to vector<8x128xf32>
    %14 = arith.addf %3, %13 : vector<8x128xf32>
    %c1_i32 = arith.constant 1 : i32
    %c0_4 = arith.constant 0 : index
    %c0_5 = arith.constant 0 : index
    %15 = vector.load %arg8[%c0_4, %c0_5] : memref<8x128xf32, #tpu.memory_space<vmem>>, vector<8x128xf32>
    %16 = arith.addf %15, %14 : vector<8x128xf32>
    %c0_6 = arith.constant 0 : index
    %c0_7 = arith.constant 0 : index
    %17 = vector.load %arg8[%c0_6, %c0_7] : memref<8x128xf32, #tpu.memory_space<vmem>>, vector<8x128xf32>
    tpu.vector_store %arg8[%c0_6, %c0_7], %16 {strides = array<i32>} : memref<8x128xf32, #tpu.memory_space<vmem>>, vector<8x128xf32>,
    %c0_i32_8 = arith.constant 0 : i32
    %18 = arith.cmpi eq, %arg0, %c0_i32_8 : i32
    %19 = arith.extui %18 : i1 to i32
    %c0_i32_9 = arith.constant 0 : i32
    %20 = arith.cmpi ne, %19, %c0_i32_9 : i32
    scf.if %20 {
      %c0_10 = arith.constant 0 : index
      %c0_11 = arith.constant 0 : index
      %21 = vector.load %arg8[%c0_10, %c0_11] : memref<8x128xf32, #tpu.memory_space<vmem>>, vector<8x128xf32>
      %22 = vector.shape_cast %21 : vector<8x128xf32> to vector<1x8x128xf32>
      %cst_12 = arith.constant dense<0.000000e+00> : vector<1xf32>
      %23 = vector.multi_reduction <add>, %22, %cst_12 [1, 2] : vector<1x8x128xf32> to vector<1xf32>
      %24 = vector.shape_cast %23 : vector<1xf32> to vector<1x1x1xf32>
      %25 = vector.extract %24[0, 0, 0] : f32 from vector<1x1x1xf32>
      %cst_13 = arith.constant 4.8828125E-4 : f32
      %26 = arith.mulf %25, %cst_13 : f32
      %cst_14 = arith.constant 0.000000e+00 : f32
      %27 = vector.broadcast %cst_14 : f32 to vector<8x128xf32>
      %c0_15 = arith.constant 0 : index
      %c0_16 = arith.constant 0 : index
      %c0_17 = arith.constant 0 : index
      %28 = vector.load %arg5[%c0_15, %c0_16, %c0_17] : memref<3x8x128xf32, #tpu.memory_space<vmem>>, vector<1x8x128xf32>
      %29 = vector.shape_cast %28 : vector<1x8x128xf32> to vector<8x128xf32>
      %c0_18 = arith.constant 0 : index
      %c0_19 = arith.constant 0 : index
      %c0_20 = arith.constant 0 : index
      %30 = vector.load %arg6[%c0_18, %c0_19, %c0_20] : memref<3x8x128xf32, #tpu.memory_space<vmem>>, vector<1x8x128xf32>
      %31 = vector.shape_cast %30 : vector<1x8x128xf32> to vector<8x128xf32>
      %32 = arith.subf %29, %31 : vector<8x128xf32>
      %c0_21 = arith.constant 0 : index
      %33 = memref.load %arg1[%c0_21] : memref<3xf32, #tpu.memory_space<smem>>
      %34 = vector.broadcast %33 : f32 to vector<8x128xf32>
      %35 = arith.addf %32, %34 : vector<8x128xf32>
      %36 = arith.mulf %35, %35 : vector<8x128xf32>
      %37 = arith.addf %27, %36 : vector<8x128xf32>
      %c1 = arith.constant 1 : index
      %c0_22 = arith.constant 0 : index
      %c0_23 = arith.constant 0 : index
      %38 = vector.load %arg5[%c1, %c0_22, %c0_23] : memref<3x8x128xf32, #tpu.memory_space<vmem>>, vector<1x8x128xf32>
      %39 = vector.shape_cast %38 : vector<1x8x128xf32> to vector<8x128xf32>
      %c1_24 = arith.constant 1 : index
      %c0_25 = arith.constant 0 : index
      %c0_26 = arith.constant 0 : index
      %40 = vector.load %arg6[%c1_24, %c0_25, %c0_26] : memref<3x8x128xf32, #tpu.memory_space<vmem>>, vector<1x8x128xf32>
      %41 = vector.shape_cast %40 : vector<1x8x128xf32> to vector<8x128xf32>
      %42 = arith.subf %39, %41 : vector<8x128xf32>
      %c1_27 = arith.constant 1 : index
      %43 = memref.load %arg1[%c1_27] : memref<3xf32, #tpu.memory_space<smem>>
      %44 = vector.broadcast %43 : f32 to vector<8x128xf32>
      %45 = arith.addf %42, %44 : vector<8x128xf32>
      %46 = arith.mulf %45, %45 : vector<8x128xf32>
      %47 = arith.addf %37, %46 : vector<8x128xf32>
      %c2 = arith.constant 2 : index
      %c0_28 = arith.constant 0 : index
      %c0_29 = arith.constant 0 : index
      %48 = vector.load %arg5[%c2, %c0_28, %c0_29] : memref<3x8x128xf32, #tpu.memory_space<vmem>>, vector<1x8x128xf32>
      %49 = vector.shape_cast %48 : vector<1x8x128xf32> to vector<8x128xf32>
      %c2_30 = arith.constant 2 : index
      %c0_31 = arith.constant 0 : index
      %c0_32 = arith.constant 0 : index
      %50 = vector.load %arg6[%c2_30, %c0_31, %c0_32] : memref<3x8x128xf32, #tpu.memory_space<vmem>>, vector<1x8x128xf32>
      %51 = vector.shape_cast %50 : vector<1x8x128xf32> to vector<8x128xf32>
      %52 = arith.subf %49, %51 : vector<8x128xf32>
      %c2_33 = arith.constant 2 : index
      %53 = memref.load %arg1[%c2_33] : memref<3xf32, #tpu.memory_space<smem>>
      %54 = vector.broadcast %53 : f32 to vector<8x128xf32>
      %55 = arith.addf %52, %54 : vector<8x128xf32>
      %56 = arith.mulf %55, %55 : vector<8x128xf32>
      %57 = arith.addf %47, %56 : vector<8x128xf32>
      %c0_34 = arith.constant 0 : index
      %58 = memref.load %arg2[%c0_34] : memref<1xf32, #tpu.memory_space<smem>>
      %cst_35 = arith.constant 5.000000e-01 : f32
      %59 = arith.mulf %cst_35, %58 : f32
      %60 = vector.broadcast %59 : f32 to vector<8x128xf32>
      %61 = arith.mulf %60, %57 : vector<8x128xf32>
      %62 = vector.broadcast %26 : f32 to vector<8x128xf32>
      %63 = arith.addf %62, %61 : vector<8x128xf32>
      %c0_36 = arith.constant 0 : index
      %c0_37 = arith.constant 0 : index
      %64 = vector.load %arg7[%c0_36, %c0_37] : memref<8x128xf32, #tpu.memory_space<vmem>>, vector<8x128xf32>
      tpu.vector_store %arg7[%c0_36, %c0_37], %63 {strides = array<i32>} : memref<8x128xf32, #tpu.memory_space<vmem>>, vector<8x128xf32>,
    } else {
    }
    return
  }
  func.func @transform_0(%arg0: i32) -> i32 {
    %c0_i32 = arith.constant 0 : i32
    %c0_i32_0 = arith.constant 0 : i32
    return %c0_i32 : i32
  }
  func.func @transform_1(%arg0: i32) -> i32 {
    %c0_i32 = arith.constant 0 : i32
    %c0_i32_0 = arith.constant 0 : i32
    return %c0_i32 : i32
  }
  func.func @transform_2(%arg0: i32) -> (i32, i32) {
    %c0_i32 = arith.constant 0 : i32
    %c0_i32_0 = arith.constant 0 : i32
    return %arg0, %c0_i32 : i32, i32
  }
  func.func @transform_3(%arg0: i32) -> (i32, i32) {
    %c0_i32 = arith.constant 0 : i32
    %c0_i32_0 = arith.constant 0 : i32
    return %arg0, %c0_i32 : i32, i32
  }
  func.func @transform_4(%arg0: i32) -> (i32, i32, i32) {
    %c0_i32 = arith.constant 0 : i32
    %c0_i32_0 = arith.constant 0 : i32
    %c0_i32_1 = arith.constant 0 : i32
    %c0_i32_2 = arith.constant 0 : i32
    return %c0_i32, %c0_i32_0, %c0_i32_1 : i32, i32, i32
  }
  func.func @transform_5(%arg0: i32) -> (i32, i32, i32) {
    %c0_i32 = arith.constant 0 : i32
    %c0_i32_0 = arith.constant 0 : i32
    %c0_i32_1 = arith.constant 0 : i32
    %c0_i32_2 = arith.constant 0 : i32
    return %c0_i32, %c0_i32_0, %c0_i32_1 : i32, i32, i32
  }
  func.func @transform_6(%arg0: i32) -> (i32, i32) {
    %c0_i32 = arith.constant 0 : i32
    %c0_i32_0 = arith.constant 0 : i32
    %c0_i32_1 = arith.constant 0 : i32
    return %c0_i32, %c0_i32_0 : i32, i32
  }
}

</mosaic_0001>

<bundles_post_ra>
// kernel: tpu_custom_call.1
= control target key start
LH: loop header
LB: loop body
LE: loop exit
PB: predicated region body
PF: predicated region fallthrough
CT: control target
= control target key end

     0   :  { %12 = vsyncpa [#allocation7], 0  ;;  %s450_s0 = inlined_call_operand.vmem [shape: f32[3], index: 0, kind: input, shape index: {}]   ;;  %s451_s1 = inlined_call_operand.<no memory space> [shape: f32[1], index: 1, kind: input, shape index: {}]   ;;  %s452_s2 = inlined_call_operand.hbm [shape: f32[16,128], index: 2, kind: input, shape index: {}]   ;;  %s453_s3 = inlined_call_operand.hbm [shape: f32[16,128], index: 3, kind: input, shape index: {}]   ;;  %s454_s4 = inlined_call_operand.hbm [shape: f32[3,8,128], index: 4, kind: input, shape index: {}]   ;;  %s455_s5 = inlined_call_operand.hbm [shape: f32[3,8,128], index: 5, kind: input, shape index: {}]   ;;  %s456_s6 = inlined_call_operand.hbm [shape: f32[8,128], index: 6, kind: output, shape index: {}]  }
   0x1   :  { %13 = vsyncpa [#allocation5], 0 }
   0x2   :  { %14 = vsyncpa [#allocation10], 0 }
   0x3   :  { %15 = vsyncpa [#allocation13], 0 }
   0x4   :  { %16 = vsyncpa [#allocation6], 0  ;;  %s23_s23 = sshll.u32 %s450_s0, 4  ;;  %s322_s24 = smov [#allocation9]   ;;  %s24_s23 = int_to_ptr.vmem [resolvable:$true] %s23_s23 }
   0x5   :  { %s46_s25 = sshll.u32 %s322_s24, 4  ;;  %s190_s28 = scalar_lea.hbm %s453_s3, 256  ;;  %s47_s25 = int_to_ptr.vmem [resolvable:$true] %s46_s25 }
   0x6   :  { %p191_p0 = scmp.ne.s32.totalorder %s453_s3, %s190_s28  ;;  %p194_p1 = scmp.lt.u32.totalorder %s190_s28, %s453_s3 }
   0x8   :  { %p196_p2 = pnand %p194_p1, %p191_p0 }
   0xa   :  { %199 = shalt.err (!%p196_p2)
}
   0xb   :  { %s200_s9 = scalar_lea.vmem %s47_s25, 256  ;;  %p205_p4 = scmp.lt.s32.totalorder %s47_s25, %s47_s25 }
   0xc   :  { %p201_p3 = scmp.ne.s32.totalorder %s47_s25, %s200_s9  ;;  %p206_p5 = scmp.lt.s32.totalorder %s200_s9, %s200_s9 }
   0xe   :  { %p207_p6 = por %p206_p5, %p205_p4 }
  0x10   :  { %p208_p7 = pnand %p207_p6, %p201_p3 }
  0x12   :  { %211 = shalt.err (!%p208_p7)
}
  0x13   :  { %s323_s0 = smov 128   ;;  %s324_s10 = smov 8  }
  0x14   :  { %52 = dma.hbm_to_vmem [thread:$0]  %s453_s3, 256, %s47_s25, [#allocation10], %s323_s0, %s323_s0, %s324_s10  }
  0x15   :  { %s212_s13 = scalar_lea.vmem %s24_s23, 16  ;;  %p217_p9 = scmp.lt.s32.totalorder %s24_s23, %s24_s23 }
  0x16   :  { %p213_p8 = scmp.ne.s32.totalorder %s24_s23, %s212_s13  ;;  %p218_p10 = scmp.lt.s32.totalorder %s212_s13, %s212_s13 }
  0x18   :  { %p219_p11 = por %p218_p10, %p217_p9 }
  0x1a   :  { %p220_p12 = pnand %p219_p11, %p213_p8 }
  0x1c   :  { %223 = shalt.err (!%p220_p12)
}
  0x1d   :  { %s325_s14 = smov [#allocation4]   ;;  %s326_s15 = smov [#allocation8]  }
  0x1e   :  { %26 = dma.vmem_to_smem %s24_s23, 16, %s325_s14, [#allocation7]  }
  0x1f   :  { %s34_s16 = sshll.u32 %s326_s15, 4  ;;  %s327_s17 = smov [#allocation11]   ;;  %s35_s16 = int_to_ptr.vmem [resolvable:$true] %s34_s16 }
  0x20   :  { %s58_s18 = sshll.u32 %s327_s17, 4  ;;  %s224_s3 = scalar_lea.hbm %s452_s2, 256  ;;  %s383_s18 = int_to_ptr.vmem [resolvable:$true] %s58_s18 }
  0x21   :  { %p225_p13 = scmp.ne.s32.totalorder %s452_s2, %s224_s3  ;;  %p228_p0 = scmp.lt.u32.totalorder %s224_s3, %s452_s2 }
  0x23   :  { %p230_p1 = pnand %p228_p0, %p225_p13 }
  0x25   :  { %233 = shalt.err (!%p230_p1)
}
  0x26   :  { %s234_s23 = scalar_lea.vmem %s35_s16, 256  ;;  %p239_p3 = scmp.lt.s32.totalorder %s35_s16, %s35_s16 }
  0x27   :  { %p235_p2 = scmp.ne.s32.totalorder %s35_s16, %s234_s23  ;;  %p240_p4 = scmp.lt.s32.totalorder %s234_s23, %s234_s23 }
  0x29   :  { %p241_p5 = por %p240_p4, %p239_p3 }
  0x2b   :  { %p242_p6 = pnand %p241_p5, %p235_p2 }
  0x2d   :  { %245 = shalt.err (!%p242_p6)
}
  0x2e   :  { %40 = dma.hbm_to_vmem [thread:$0]  %s452_s2, 256, %s35_s16, [#allocation5], %s323_s0, %s323_s0, %s324_s10  }
  0x2f   :  { %s246_s30 = scalar_lea.hbm %s454_s4, 384 }
  0x30   :  { %p247_p7 = scmp.ne.s32.totalorder %s454_s4, %s246_s30  ;;  %p250_p8 = scmp.lt.u32.totalorder %s246_s30, %s454_s4 }
  0x32   :  { %p252_p9 = pnand %p250_p8, %p247_p7 }
  0x34   :  { %255 = shalt.err (!%p252_p9)
}
  0x35   :  { %s256_s12 = scalar_lea.vmem %s383_s18, 384  ;;  %p261_p11 = scmp.lt.s32.totalorder %s383_s18, %s383_s18 }
  0x36   :  { %p257_p10 = scmp.ne.s32.totalorder %s383_s18, %s256_s12  ;;  %p262_p12 = scmp.lt.s32.totalorder %s256_s12, %s256_s12 }
  0x38   :  { %p263_p13 = por %p262_p12, %p261_p11 }
  0x3a   :  { %p264_p0 = pnand %p263_p13, %p257_p10 }
  0x3c   :  { %267 = shalt.err (!%p264_p0)
}
  0x3d   :  { %64 = dma.hbm_to_vmem [thread:$0]  %s454_s4, 384, %s383_s18, [#allocation10], %s323_s0, %s323_s0, %s324_s10  }
  0x3e   :  { %s328_s14 = smov [#allocation12]   ;;  %s268_s19 = scalar_lea.hbm %s455_s5, 384 }
  0x3f   :  { %s70_s15 = sshll.u32 %s328_s14, 4  ;;  %p269_p1 = scmp.ne.s32.totalorder %s455_s5, %s268_s19  ;;  %s71_s15 = int_to_ptr.vmem [resolvable:$true] %s70_s15 }
  0x40   :  { %p272_p2 = scmp.lt.u32.totalorder %s268_s19, %s455_s5 }
  0x42   :  { %p274_p3 = pnand %p272_p2, %p269_p1 }
  0x44   :  { %277 = shalt.err (!%p274_p3)
}
  0x45   :  { %s278_s24 = scalar_lea.vmem %s71_s15, 384  ;;  %p283_p5 = scmp.lt.s32.totalorder %s71_s15, %s71_s15 }
  0x46   :  { %p279_p4 = scmp.ne.s32.totalorder %s71_s15, %s278_s24  ;;  %p284_p6 = scmp.lt.s32.totalorder %s278_s24, %s278_s24 }
  0x48   :  { %p285_p7 = por %p284_p6, %p283_p5 }
  0x4a   :  { %p286_p8 = pnand %p285_p7, %p279_p4 }
  0x4c   :  { %289 = shalt.err (!%p286_p8)
}
  0x4d   :  { %76 = dma.hbm_to_vmem [thread:$0]  %s455_s5, 384, %s71_s15, [#allocation13], %s323_s0, %s323_s0, %s324_s10  }
  0x4e   :  { %312 = dma.done.wait [#allocation7], 16  }
  0x4f   :  { %313 = vsyncadd [#allocation7], 4294967280 }
  0x50   :  { %314 = dma.done.wait [#allocation5], 256  }
  0x51   :  { %315 = vsyncadd [#allocation5], 4294967040 }
  0x52   :  { %316 = dma.done.wait [#allocation10], 640  }
  0x53   :  { %317 = vsyncadd [#allocation10], 4294966656 }
  0x54   :  { %318 = dma.done.wait [#allocation13], 384  }
  0x55   :  { %319 = vsyncadd [#allocation13], 4294966912 }
  0x56   :  { %92 = sfence }
  0x57   :  { %v98_v0 = vld [vmem:[#allocation8] sm:$0xff]  ;;  %v99_v1 = vld [vmem:[#allocation8 + $0x8] sm:$0xff]  ;;  %v100_v2 = vld [vmem:[#allocation9] sm:$0xff]  ;;  %s128_s5 = sld [smem:[#allocation4]]  ;;  %s178_s0 = sld [smem:[#allocation4 + $0x1]] }
  0x58   :  { %v101_v3 = vld [vmem:[#allocation9 + $0x8] sm:$0xff]  ;;  %v102_v4 = vsub.f32 %v98_v0, %v100_v2  ;;  %v125_v16 = vld [vmem:[#allocation11] sm:$0xff]  ;;  %v134_v18 = vld [vmem:[#allocation11 + $0x8] sm:$0xff]  ;;  %s179_s10 = sld [smem:[#allocation4 + $0x2]]  ;;  %s154_s26 = smul.f32 0.5, %s451_s1 }
  0x59   :  { %v103_v5 = vsub.f32 %v99_v1, %v101_v3  ;;  %v126_v17 = vld [vmem:[#allocation12] sm:$0xff]  ;;  %v136_v19 = vld [vmem:[#allocation12 + $0x8] sm:$0xff]  ;;  %v144_v24 = vld [vmem:[#allocation11 + $0x10] sm:$0xff]  ;;  %s329_s29 = smov [#allocation14]  }
  0x5a   :  { %v104_v6 = vmul.f32 %v102_v4, %v102_v4  ;;  %v127_v20 = vsub.f32 %v125_v16, %v126_v17  ;;  %v137_v21 = vsub.f32 %v134_v18, %v136_v19  ;;  %v146_v25 = vld [vmem:[#allocation12 + $0x10] sm:$0xff]  ;;  %v155_v36 = vstv %s154_s26  ;;  %s166_s30 = sshll.u32 %s329_s29, 4  ;;  %s167_s30 = int_to_ptr.vmem [resolvable:$true] %s166_s30 }
  0x5b   :  { %v105_v7 = vmul.f32 %v103_v5, %v103_v5  ;;  %v147_v28 = vsub.f32 %v144_v24, %v146_v25  ;;  %s290_s7 = scalar_lea.vmem %s167_s30, 128  ;;  %p295_p10 = scmp.lt.s32.totalorder %s167_s30, %s167_s30 }
  0x5c   :  { %p291_p9 = scmp.ne.s32.totalorder %s167_s30, %s290_s7  ;;  %p296_p11 = scmp.lt.s32.totalorder %s290_s7, %s290_s7 }
  0x5d   :  { %v106_v8 = vadd.f32 %v105_v7, %v104_v6  ;;  %v129_v22 = vstv %s128_s5  ;;  %v139_v23 = vstv %s178_s0 }
  0x5e   :  { %v130_v26 = vadd.f32 %v129_v22, %v127_v20  ;;  %v140_v27 = vadd.f32 %v139_v23, %v137_v21  ;;  %v149_v29 = vstv %s179_s10  ;;  %p297_p12 = por %p296_p11, %p295_p10 }
  0x5f   :  { %115 = vadd.xlane.f32.xlu0 %v106_v8  ;;  %v150_v32 = vadd.f32 %v149_v29, %v147_v28 }
  0x60   :  { %v131_v30 = vmul.f32 %v130_v26, %v130_v26  ;;  %v141_v31 = vmul.f32 %v140_v27, %v140_v27  ;;  %p298_p13 = pnand %p297_p12, %p291_p9 }
  0x61   :  { %v151_v34 = vmul.f32 %v150_v32, %v150_v32 }
  0x62   :  { %v142_v33 = vadd.f32 %v141_v31, %v131_v30 }
  0x64   :  { %v152_v35 = vadd.f32 %v151_v34, %v142_v33 }
  0x66   :  { %v156_v37 = vmul.f32 %v155_v36, %v152_v35 }
  0xec   :  { %v116_v9 = vpop.xlane.xlu0 %115 }
  0xed   :  { %v117_v10 = vrot.slane %v116_v9, 4 }
  0xef   :  { %v118_v11 = vadd.f32 %v117_v10, %v116_v9 }
  0xf1   :  { %v119_v12 = vrot.slane %v118_v11, 2 }
  0xf3   :  { %v120_v13 = vadd.f32 %v119_v12, %v118_v11 }
  0xf5   :  { %v121_v14 = vrot.slane %v120_v13, 1 }
  0xf7   :  { %v122_v15 = vadd.f32 %v121_v14, %v120_v13 }
  0xf9   :  { %180 = vpush %v122_v15 }
 0x12a   :  { %s181_s27 = spop %180 }
 0x12b   :  { %s124_s28 = smul.f32 0.00048828125, %s181_s27 }
 0x12d   :  { %v157_v38 = vstv %s124_s28 }
 0x12e   :  { %v158_v39 = vadd.f32 %v157_v38, %v156_v37 }
 0x130   :  { %159 = vst [vmem:[#allocation14] sm:$0xff] %v158_v39 }
 0x131   :  { %301 = shalt.err (!%p298_p13)
}
 0x132   :  { %s302_s9 = scalar_lea.hbm %s456_s6, 128 }
 0x133   :  { %p303_p0 = scmp.ne.s32.totalorder %s456_s6, %s302_s9  ;;  %p306_p1 = scmp.lt.u32.totalorder %s302_s9, %s456_s6 }
 0x135   :  { %p308_p2 = pnand %p306_p1, %p303_p0 }
 0x137   :  { %311 = shalt.err (!%p308_p2)
}
 0x138   :  { %169 = dma.vmem_to_hbm [thread:$0]  %s167_s30, 128, %s456_s6, [#allocation6]  }
 0x139   :  { %320 = dma.done.wait [#allocation6], 128  }
 0x13a   :  { %321 = vsyncadd [#allocation6], 4294967168 }
 0x13b   :  { %173 = vsyncpa [#allocation5], 1 }
 0x13c   :  { %174 = vsyncpa [#allocation10], 1 }
 0x13d   :  { %175 = vsyncpa [#allocation13], 1 }
 0x13e   :  { %176 = vsyncpa [#allocation6], 1 }
 0x13f   :  { %177 = vsyncpa [#allocation7], 1 }

</bundles_post_ra>
